<compile_context>
chip_gen: v5e
topology: v5e:2x2
jax: 0.10.0
libtpu: 0.0.40
codegen_flags: <defaults>
</compile_context>

<pallas_src>
import jax
import jax.numpy as jnp
from jax.experimental import pallas as pl
from jax.experimental.pallas import tpu as pltpu


def _round_up(n: int, m: int) -> int:
    return ((n + m - 1) // m) * m


# ---------------------------------------------------------------------------
# Kernels
# ---------------------------------------------------------------------------
def _block_kernel_resident(x_ref, w1_ref, b1_ref, w2_ref, b2_ref, o_ref):
    """Fused residual MLP block with fully VMEM-resident weights."""
    x = x_ref[...]                                   # (tm, Np), kept in out dtype (residual!)
    cdt = w1_ref.dtype                               # matmul operand dtype (bf16 by default)
    h = jnp.tanh(
        jnp.dot(x.astype(cdt), w1_ref[...], preferred_element_type=jnp.float32)
        + b1_ref[...].astype(jnp.float32)
    )
    y = jnp.tanh(
        jnp.dot(h.astype(cdt), w2_ref[...], preferred_element_type=jnp.float32)
        + b2_ref[...].astype(jnp.float32)
    )
    o_ref[...] = (y + x.astype(jnp.float32)).astype(o_ref.dtype)


def _block_kernel_ktiled(x_ref, w1_ref, b1_ref, w2_ref, b2_ref, o_ref, acc_ref):
    """Hidden-width-tiled fallback: accumulate partial L2 products in f32 VMEM scratch."""
    j = pl.program_id(1)

    @pl.when(j == 0)
    def _init():
        acc_ref[...] = jnp.zeros_like(acc_ref)

    x = x_ref[...]                                   # resident across the width axis
    cdt = w1_ref.dtype
    h = jnp.tanh(
        jnp.dot(x.astype(cdt), w1_ref[...], preferred_element_type=jnp.float32)
        + b1_ref[...].astype(jnp.float32)
    )
    acc_ref[...] += jnp.dot(h.astype(cdt), w2_ref[...],
                            preferred_element_type=jnp.float32)

    @pl.when(j == pl.num_programs(1) - 1)
    def _finish():
        y = jnp.tanh(acc_ref[...] + b2_ref[...].astype(jnp.float32))
        o_ref[...] = (y + x.astype(jnp.float32)).astype(o_ref.dtype)


# ---------------------------------------------------------------------------
# Feature probe: single-buffered resident operands (pl.Buffered(1))
# ---------------------------------------------------------------------------
_SINGLE_BUF_OK = None


def _single_buffered_resident_supported():
    """Probe once whether pipeline_mode=pl.Buffered(1) lowers & runs on this runtime.

    Single-buffering the never-refetched resident weights halves their VMEM footprint
    (review item: resident operands).  If the runtime rejects it, we silently keep the
    default double-buffered constant-index-map specs (identical numerics, just more VMEM).
    """
    global _SINGLE_BUF_OK
    if _SINGLE_BUF_OK is not None:
        return _SINGLE_BUF_OK
    try:
        def _probe(x_ref, o_ref):
            o_ref[...] = x_ref[...] + 1.0

        fn = pl.pallas_call(
            _probe,
            out_shape=jax.ShapeDtypeStruct((8, 128), jnp.float32),
            grid_spec=pltpu.PrefetchScalarGridSpec(
                num_scalar_prefetch=0,
                grid=(2,),
                in_specs=[pl.BlockSpec((8, 128), lambda i: (0, 0),
                                       pipeline_mode=pl.Buffered(1))],
                out_specs=pl.BlockSpec((8, 128), lambda i: (0, 0)),
            ),
        )
        res = jax.block_until_ready(fn(jnp.zeros((8, 128), jnp.float32)))
        _SINGLE_BUF_OK = bool(jnp.allclose(res, 1.0))
    except Exception:
        _SINGLE_BUF_OK = False
    return _SINGLE_BUF_OK


# ---------------------------------------------------------------------------
# Wrapper
# ---------------------------------------------------------------------------
def prepare_block_params(w1, b1, w2, b2, *, compute_dtype=jnp.bfloat16):
    """Pad (lane-dense multiples of 128) and cast the Block parameters ONCE.

    Hoisting this out of the per-call path removes a full read+write of the weight
    matrices from every forward call.  Zero padding keeps the math exact
    (tanh(0) = 0, zero rows/cols contribute nothing to the contractions).
    """
    w1 = jnp.asarray(w1)
    w2 = jnp.asarray(w2)
    b1 = jnp.asarray(b1).reshape(1, -1)
    b2 = jnp.asarray(b2).reshape(1, -1)
    in_N, width = w1.shape
    width_w2, out_N = w2.shape
    assert width_w2 == width and b1.shape[1] == width and b2.shape[1] == out_N
    assert out_N == in_N, "residual connection requires out_N == in_N"

    Np = _round_up(in_N, 128)   # padded in_N == padded out_N (residual)
    Wp = _round_up(width, 128)  # padded hidden width
    w1p = jnp.zeros((Np, Wp), compute_dtype).at[:in_N, :width].set(w1.astype(compute_dtype))
    b1p = jnp.zeros((1, Wp), jnp.float32).at[:, :width].set(b1.astype(jnp.float32))
    w2p = jnp.zeros((Wp, Np), compute_dtype).at[:width, :out_N].set(w2.astype(compute_dtype))
    b2p = jnp.zeros((1, Np), jnp.float32).at[:, :out_N].set(b2.astype(jnp.float32))
    return w1p, b1p, w2p, b2p, out_N


def _block_apply(x, w1p, b1p, w2p, b2p, *, out_N, tm=None, force_ktiled=False,
                 single_buffer_weights=False):
    assert x.ndim == 2
    B, in_N = x.shape
    Np, Wp = w1p.shape
    out_dtype = x.dtype
    cdt = w1p.dtype
    x_item = jnp.dtype(out_dtype).itemsize
    w_item = jnp.dtype(cdt).itemsize

    # ---- generation-aware VMEM budget (v5e/v6e: 128 MiB, v7x: 64 MiB per TC) ----
    try:
        vmem_cap = int(pltpu.get_tpu_info().vmem_capacity_bytes)
    except Exception:
        vmem_cap = 64 << 20                      # conservative (v7x-sized) fallback
    if vmem_cap > (64 << 20):                    # v5e / v6e class
        budget, limit_cap, tm_cap = 64 << 20, 100 << 20, 1024
    else:                                        # v7x class
        budget, limit_cap, tm_cap = 40 << 20, 56 << 20, 512

    # ---- lane-dense features: pad x only when in_N is not already 128-aligned ----
    if in_N != Np:
        xk = jnp.zeros((B, Np), out_dtype).at[:, :in_N].set(x)
    else:
        xk = x                                   # no extra HBM copy when already aligned

    # ---- batch tile; ragged tail is handled by the grid (masked boundary block) ----
    if tm is None:
        t = min(tm_cap, _round_up(B, 8))
    else:
        t = max(8, _round_up(int(tm), 8))

    w_copies = 1 if single_buffer_weights else 2          # W1/W2 buffer count
    weight_bytes = w_copies * (2 * Np * Wp * w_item) + 2 * (Wp + Np) * 4

    def resident_bytes(bt):
        io = 4 * bt * Np * x_item                          # double-buffered x and out tiles
        tmp = bt * (2 * Np + Wp) * 4 + bt * (Np + Wp) * w_item  # f32 h/y/x + operand casts
        return weight_bytes + io + tmp

    use_ktiled = bool(force_ktiled)
    if not use_ktiled and resident_bytes(min(t, 128)) > budget:
        use_ktiled = True   # weights too large to stay resident with a useful batch tile

    if not use_ktiled:
        while t > 8 and resident_bytes(t) > budget:
            t = max(8, _round_up(t // 2, 8))
        vmem_limit = int(min(max(int(1.25 * resident_bytes(t)) + (2 << 20), 16 << 20),
                             limit_cap))

        if single_buffer_weights:
            def _wspec(shape):
                return pl.BlockSpec(shape, lambda i: (0, 0), pipeline_mode=pl.Buffered(1))
        else:
            def _wspec(shape):
                return pl.BlockSpec(shape, lambda i: (0, 0))

        out = pl.pallas_call(
            _block_kernel_resident,
            out_shape=jax.ShapeDtypeStruct((B, Np), out_dtype),
            grid_spec=pltpu.PrefetchScalarGridSpec(
                num_scalar_prefetch=0,
                grid=(pl.cdiv(B, t),),
                in_specs=[
                    pl.BlockSpec((t, Np), lambda i: (i, 0)),   # x tile (lane-dense)
                    _wspec((Np, Wp)),                           # W1 (resident)
                    pl.BlockSpec((1, Wp), lambda i: (0, 0)),    # b1 (tiny)
                    _wspec((Wp, Np)),                           # W2 (resident)
                    pl.BlockSpec((1, Np), lambda i: (0, 0)),    # b2 (tiny)
                ],
                out_specs=pl.BlockSpec((t, Np), lambda i: (i, 0)),
            ),
            compiler_params=pltpu.CompilerParams(
                # Batch tiles are independent -> may shard across v7x's two TensorCores.
                # If a profile shows one TC idle, escalate to CORE_PARALLEL / core_map.
                dimension_semantics=("parallel",),
                vmem_limit_bytes=vmem_limit,
            ),
        )(xk, w1p, b1p, w2p, b2p)
    else:
        # ---- K-tiled fallback: stream W1/W2 in hidden-width tiles ----
        def ktiled_bytes(bt, wt):
            wtb = 2 * ((Np * wt + wt * Np) * w_item + wt * 4) + Np * 4
            io = 4 * bt * Np * x_item
            acc = bt * Np * 4
            tmp = bt * (2 * Np + wt) * 4 + bt * (Np + wt) * w_item
            return wtb + io + acc + tmp

        tw = 128
        for cand in (1024, 512, 256):
            if Wp % cand == 0 and ktiled_bytes(min(t, 128), cand) <= budget:
                tw = cand
                break
        while t > 8 and ktiled_bytes(t, tw) > budget:
            t = max(8, _round_up(t // 2, 8))
        vmem_limit = int(min(max(int(1.25 * ktiled_bytes(t, tw)) + (2 << 20), 16 << 20),
                             limit_cap))

        out = pl.pallas_call(
            _block_kernel_ktiled,
            out_shape=jax.ShapeDtypeStruct((B, Np), out_dtype),
            grid_spec=pltpu.PrefetchScalarGridSpec(
                num_scalar_prefetch=0,
                grid=(pl.cdiv(B, t), Wp // tw),
                in_specs=[
                    pl.BlockSpec((t, Np), lambda i, j: (i, 0)),   # x (resident across j)
                    pl.BlockSpec((Np, tw), lambda i, j: (0, j)),  # W1 width tile
                    pl.BlockSpec((1, tw), lambda i, j: (0, j)),   # b1 width tile
                    pl.BlockSpec((tw, Np), lambda i, j: (j, 0)),  # W2 width tile
                    pl.BlockSpec((1, Np), lambda i, j: (0, 0)),   # b2
                ],
                out_specs=pl.BlockSpec((t, Np), lambda i, j: (i, 0)),
                scratch_shapes=[pltpu.VMEM((t, Np), jnp.float32)],
            ),
            compiler_params=pltpu.CompilerParams(
                dimension_semantics=("parallel", "arbitrary"),   # reduction axis last
                vmem_limit_bytes=vmem_limit,
            ),
        )(xk, w1p, b1p, w2p, b2p)

    if Np != out_N:
        out = out[:, :out_N]
    return out


def make_block_forward(w1, b1, w2, b2, *, compute_dtype=jnp.bfloat16, tm=None,
                       force_ktiled=False):
    """Build a jitted forward(x) for Block; parameters padded/cast once at construction."""
    w1p, b1p, w2p, b2p, out_N = prepare_block_params(w1, b1, w2, b2,
                                                     compute_dtype=compute_dtype)
    single_buf = (not force_ktiled) and _single_buffered_resident_supported()

    @jax.jit
    def _fwd(x, w1p_, b1p_, w2p_, b2p_):
        return _block_apply(x, w1p_, b1p_, w2p_, b2p_, out_N=out_N, tm=tm,
                            force_ktiled=force_ktiled,
                            single_buffer_weights=single_buf)

    def forward(x):
        return _fwd(x, w1p, b1p, w2p, b2p)

    return forward


# ---------------------------------------------------------------------------
# Demo / correctness checks
# ---------------------------------------------------------------------------
if __name__ == "__main__":
    # Small shapes consistent with the module: Block(in_N=32, width=64, out_N=32)
    B, in_N, width, out_N = 16, 32, 64, 32

    key = jax.random.PRNGKey(0)
    kx, kw1, kb1, kw2, kb2 = jax.random.split(key, 5)
    bound1 = 1.0 / jnp.sqrt(in_N)
    bound2 = 1.0 / jnp.sqrt(width)
    x = jax.random.normal(kx, (B, in_N), dtype=jnp.float32)
    w1 = jax.random.uniform(kw1, (in_N, width), jnp.float32, -bound1, bound1)
    b1 = jax.random.uniform(kb1, (width,), jnp.float32, -bound1, bound1)
    w2 = jax.random.uniform(kw2, (width, out_N), jnp.float32, -bound2, bound2)
    b2 = jax.random.uniform(kb2, (out_N,), jnp.float32, -bound2, bound2)

    ref = jnp.tanh(jnp.tanh(x @ w1 + b1) @ w2 + b2) + x

    # 1) Default path: bf16 matmul operands, f32 accumulation/residual, resident weights.
    fwd_bf16 = make_block_forward(w1, b1, w2, b2)   # compute_dtype defaults to bfloat16
    out_bf16 = jax.block_until_ready(fwd_bf16(x))
    assert out_bf16.shape == (B, out_N)
    assert jnp.allclose(out_bf16, ref, atol=3e-2, rtol=3e-2)

    # 2) f32 compute path: tight correctness check of the resident-weights kernel.
    fwd_f32 = make_block_forward(w1, b1, w2, b2, compute_dtype=jnp.float32)
    out_f32 = jax.block_until_ready(fwd_f32(x))
    assert out_f32.shape == (B, out_N)
    assert jnp.allclose(out_f32, ref, atol=1e-5, rtol=1e-5)

    # 3) K-tiled fallback path + ragged batch + non-128-aligned feature dims (f32 compute).
    B2, in_N2, width2 = 10, 40, 300
    k2 = jax.random.split(jax.random.PRNGKey(1), 5)
    bound3 = 1.0 / jnp.sqrt(in_N2)
    bound4 = 1.0 / jnp.sqrt(width2)
    x2 = jax.random.normal(k2[0], (B2, in_N2), dtype=jnp.float32)
    w3 = jax.random.uniform(k2[1], (in_N2, width2), jnp.float32, -bound3, bound3)
    b3 = jax.random.uniform(k2[2], (width2,), jnp.float32, -bound3, bound3)
    w4 = jax.random.uniform(k2[3], (width2, in_N2), jnp.float32, -bound4, bound4)
    b4 = jax.random.uniform(k2[4], (in_N2,), jnp.float32, -bound4, bound4)
    ref2 = jnp.tanh(jnp.tanh(x2 @ w3 + b3) @ w4 + b4) + x2

    fwd_kt = make_block_forward(w3, b3, w4, b4, compute_dtype=jnp.float32,
                                force_ktiled=True)
    out_kt = jax.block_until_ready(fwd_kt(x2))
    assert out_kt.shape == (B2, in_N2)
    assert jnp.allclose(out_kt, ref2, atol=1e-4, rtol=1e-4)

    print("KERNEL_OK")
</pallas_src>

<mosaic_0001>
module attributes {stable_mosaic.version = 11 : i64} {
  func.func @_probe(%arg0: i32, %arg1: memref<8x128xf32, #tpu.memory_space<vmem>>, %arg2: memref<8x128xf32, #tpu.memory_space<vmem>>) attributes {dimension_semantics = [#tpu.dimension_semantics<arbitrary>], iteration_bounds = array<i64: 2>, scalar_prefetch = 0 : i64, scratch_operands = 0 : i64, tpu.core_type = #tpu.core_type<tc>, window_params = [{pipeline_mode = #tpu.pipeline_mode<synchronous>, transform_indices = @transform_0, window_bounds = array<i64: 8, 128>}, {pipeline_mode = #tpu.pipeline_mode<synchronous>, transform_indices = @transform_1, window_bounds = array<i64: 8, 128>}]} {
    %c0 = arith.constant 0 : index
    %c0_0 = arith.constant 0 : index
    %0 = vector.load %arg1[%c0, %c0_0] : memref<8x128xf32, #tpu.memory_space<vmem>>, vector<8x128xf32>
    %cst = arith.constant 1.000000e+00 : f32
    %1 = vector.broadcast %cst : f32 to vector<8x128xf32>
    %2 = arith.addf %0, %1 : vector<8x128xf32>
    %c0_1 = arith.constant 0 : index
    %c0_2 = arith.constant 0 : index
    %3 = vector.load %arg2[%c0_1, %c0_2] : memref<8x128xf32, #tpu.memory_space<vmem>>, vector<8x128xf32>
    tpu.vector_store %arg2[%c0_1, %c0_2], %2 {strides = array<i32>} : memref<8x128xf32, #tpu.memory_space<vmem>>, vector<8x128xf32>,
    return
  }
  func.func @transform_0(%arg0: i32) -> (i32, i32) {
    %c0_i32 = arith.constant 0 : i32
    %c0_i32_0 = arith.constant 0 : i32
    %c0_i32_1 = arith.constant 0 : i32
    return %c0_i32, %c0_i32_0 : i32, i32
  }
  func.func @transform_1(%arg0: i32) -> (i32, i32) {
    %c0_i32 = arith.constant 0 : i32
    %c0_i32_0 = arith.constant 0 : i32
    %c0_i32_1 = arith.constant 0 : i32
    return %c0_i32, %c0_i32_0 : i32, i32
  }
}

module attributes {stable_mosaic.version = 11 : i64} {
  func.func @_block_kernel_resident(%arg0: i32, %arg1: memref<16x128xf32, #tpu.memory_space<vmem>>, %arg2: memref<128x128xbf16, #tpu.memory_space<vmem>>, %arg3: memref<1x128xf32, #tpu.memory_space<vmem>>, %arg4: memref<128x128xbf16, #tpu.memory_space<vmem>>, %arg5: memref<1x128xf32, #tpu.memory_space<vmem>>, %arg6: memref<16x128xf32, #tpu.memory_space<vmem>>) attributes {dimension_semantics = [#tpu.dimension_semantics<parallel>], iteration_bounds = array<i64: 1>, scalar_prefetch = 0 : i64, scratch_operands = 0 : i64, tpu.core_type = #tpu.core_type<tc>, window_params = [{transform_indices = @transform_0, window_bounds = array<i64: 16, 128>}, {pipeline_mode = #tpu.pipeline_mode<synchronous>, transform_indices = @transform_1, window_bounds = array<i64: 128, 128>}, {pipeline_mode = #tpu.pipeline_mode<synchronous>, transform_indices = @transform_2, window_bounds = array<i64: 1, 128>}, {pipeline_mode = #tpu.pipeline_mode<synchronous>, transform_indices = @transform_3, window_bounds = array<i64: 128, 128>}, {pipeline_mode = #tpu.pipeline_mode<synchronous>, transform_indices = @transform_4, window_bounds = array<i64: 1, 128>}, {transform_indices = @transform_5, window_bounds = array<i64: 16, 128>}]} {
    %c0 = arith.constant 0 : index
    %c0_0 = arith.constant 0 : index
    %0 = vector.load %arg1[%c0, %c0_0] : memref<16x128xf32, #tpu.memory_space<vmem>>, vector<16x128xf32>
    %1 = arith.truncf %0 : vector<16x128xf32> to vector<16x128xbf16>
    %c0_1 = arith.constant 0 : index
    %c0_2 = arith.constant 0 : index
    %2 = vector.load %arg2[%c0_1, %c0_2] : memref<128x128xbf16, #tpu.memory_space<vmem>>, vector<128x128xbf16>
    %cst = arith.constant dense<0.000000e+00> : vector<16x128xf32>
    %3 = tpu.matmul %1, %2, %cst {dimension_numbers = #tpu.dot_dimension_numbers<[1], [0], [0], [1], [0, 0, 1, 1], [], []>} : vector<16x128xbf16>, vector<128x128xbf16>, vector<16x128xf32> -> vector<16x128xf32>
    %c0_3 = arith.constant 0 : index
    %c0_4 = arith.constant 0 : index
    %4 = vector.load %arg3[%c0_3, %c0_4] : memref<1x128xf32, #tpu.memory_space<vmem>>, vector<1x128xf32>
    %5 = vector.broadcast %4 : vector<1x128xf32> to vector<16x128xf32>
    %6 = arith.addf %3, %5 : vector<16x128xf32>
    %7 = math.tanh %6 : vector<16x128xf32>
    %8 = arith.truncf %7 : vector<16x128xf32> to vector<16x128xbf16>
    %c0_5 = arith.constant 0 : index
    %c0_6 = arith.constant 0 : index
    %9 = vector.load %arg4[%c0_5, %c0_6] : memref<128x128xbf16, #tpu.memory_space<vmem>>, vector<128x128xbf16>
    %cst_7 = arith.constant dense<0.000000e+00> : vector<16x128xf32>
    %10 = tpu.matmul %8, %9, %cst_7 {dimension_numbers = #tpu.dot_dimension_numbers<[1], [0], [0], [1], [0, 0, 1, 1], [], []>} : vector<16x128xbf16>, vector<128x128xbf16>, vector<16x128xf32> -> vector<16x128xf32>
    %c0_8 = arith.constant 0 : index
    %c0_9 = arith.constant 0 : index
    %11 = vector.load %arg5[%c0_8, %c0_9] : memref<1x128xf32, #tpu.memory_space<vmem>>, vector<1x128xf32>
    %12 = vector.broadcast %11 : vector<1x128xf32> to vector<16x128xf32>
    %13 = arith.addf %10, %12 : vector<16x128xf32>
    %14 = math.tanh %13 : vector<16x128xf32>
    %15 = arith.addf %14, %0 : vector<16x128xf32>
    %c0_10 = arith.constant 0 : index
    %c0_11 = arith.constant 0 : index
    %16 = vector.load %arg6[%c0_10, %c0_11] : memref<16x128xf32, #tpu.memory_space<vmem>>, vector<16x128xf32>
    tpu.vector_store %arg6[%c0_10, %c0_11], %15 {strides = array<i32>} : memref<16x128xf32, #tpu.memory_space<vmem>>, vector<16x128xf32>,
    return
  }
  func.func @transform_0(%arg0: i32) -> (i32, i32) {
    %c0_i32 = arith.constant 0 : i32
    %c0_i32_0 = arith.constant 0 : i32
    return %arg0, %c0_i32 : i32, i32
  }
  func.func @transform_1(%arg0: i32) -> (i32, i32) {
    %c0_i32 = arith.constant 0 : i32
    %c0_i32_0 = arith.constant 0 : i32
    %c0_i32_1 = arith.constant 0 : i32
    return %c0_i32, %c0_i32_0 : i32, i32
  }
  func.func @transform_2(%arg0: i32) -> (i32, i32) {
    %c0_i32 = arith.constant 0 : i32
    %c0_i32_0 = arith.constant 0 : i32
    %c0_i32_1 = arith.constant 0 : i32
    return %c0_i32, %c0_i32_0 : i32, i32
  }
  func.func @transform_3(%arg0: i32) -> (i32, i32) {
    %c0_i32 = arith.constant 0 : i32
    %c0_i32_0 = arith.constant 0 : i32
    %c0_i32_1 = arith.constant 0 : i32
    return %c0_i32, %c0_i32_0 : i32, i32
  }
  func.func @transform_4(%arg0: i32) -> (i32, i32) {
    %c0_i32 = arith.constant 0 : i32
    %c0_i32_0 = arith.constant 0 : i32
    %c0_i32_1 = arith.constant 0 : i32
    return %c0_i32, %c0_i32_0 : i32, i32
  }
  func.func @transform_5(%arg0: i32) -> (i32, i32) {
    %c0_i32 = arith.constant 0 : i32
    %c0_i32_0 = arith.constant 0 : i32
    return %arg0, %c0_i32 : i32, i32
  }
}

</mosaic_0001>

<bundles_post_ra>
// kernel: tpu_custom_call.1
= control target key start
LH: loop header
LB: loop body
LE: loop exit
PB: predicated region body
PF: predicated region fallthrough
CT: control target
= control target key end

     0   :  { %6 = vsyncpa [#allocation3], 0  ;;  %s287_s0 = inlined_call_operand.hbm [shape: f32[8,128], index: 0, kind: input, shape index: {}]   ;;  %s288_s1 = inlined_call_operand.hbm [shape: f32[8,128], index: 1, kind: output, shape index: {}]  }
   0x1   :  { %7 = vsyncpa [#allocation4], 0  ;;  %s270_s6 = smov 0  }
   0x2 LB: > { %s149_s7 = sadd.s32 4294967295, %s256_s6   ;;  %p150_p0 = scmp.ge.s32.totalorder %s256_s6, 1  ;;  %s256_s6 = sphi %s270_s6, %s13_s6  }
   0x3   : > { %p60_p1 = scmp.lt.s32.totalorder %s256_s6, 3  ;;  %s72_s10 = sshll.u32 %s287_s0, 4  ;;  %s73_s10 = int_to_ptr.hbm [resolvable:$true] %s72_s10 }
   0x4   : > { %p170_p3 = scmp.eq.s32.totalorder %s149_s7, 0  ;;  %s258_s11 = smov [#allocation2]  }
   0x5   : > { %p61_p2 = pnand %p150_p0, %p60_p1  ;;  %s74_s12 = sshll.u32 %s258_s11, 4  ;;  %s75_s12 = int_to_ptr.vmem [resolvable:$true] %s74_s12 }
   0x7   : > { %p166_p4 = pneg %p61_p2  ;;  %87 = sbr.rel (%p61_p2) target bundleno = 20 (0x14), region = 24 }
   0x9   : > { %p167_p5 = pnand %p170_p3, %p166_p4 }
   0xb   : > { %169 = dma.hbm_to_vmem [thread:$0]  (!%p167_p5), %s73_s10, 128, %s75_s12, [#allocation3]  }
   0xc   : > { %247 = dma.done.wait (%p170_p3), [#allocation3], 128  }
   0xd   : > { %249 = vsyncadd (%p170_p3), [#allocation3], 4294967168  ;;  %s259_s13 = smov [#allocation5]   ;;  %s109_s17 = sshll.u32 %s288_s1, 4  ;;  %v98_v0 = vld [vmem:[#allocation2] sm:$0xff]  ;;  %s110_s17 = int_to_ptr.hbm [resolvable:$true] %s109_s17 }
   0xe   : > { %s107_s14 = sshll.u32 %s259_s13, 4  ;;  %p172_p6 = scmp.eq.s32.totalorder %s149_s7, 1  ;;  %v99_v1 = vadd.f32 1.0, %v98_v0  ;;  %s108_s14 = int_to_ptr.vmem [resolvable:$true] %s107_s14 }
  0x10   : > { %100 = vst [vmem:[#allocation5] sm:$0xff] %v99_v1 }
  0x11   : > { %163 = dma.vmem_to_hbm [thread:$0]  (%p172_p6), %s108_s14, 128, %s110_s17, [#allocation4]  }
  0x12   : > { %251 = dma.done.wait (%p172_p6), [#allocation4], 128  }
  0x13   : > { %253 = vsyncadd (%p172_p6), [#allocation4], 4294967168 }
  0x14 PF: > { %s13_s6 = sadd.s32 1, %s256_s6  }
  0x15   : > { %p10_p7 = scmp.ge.s32.totalorder %s13_s6, 4  }
  0x17   :  { %12 = sbr.rel (!%p10_p7) target bundleno = 2 (0x2), region = 53 }
  0x1c   :  { %123 = vsyncpa [#allocation3], 1 }
  0x1d   :  { %125 = vsyncpa [#allocation3 + $0x1], 1 }
  0x1e   :  { %126 = vsyncpa [#allocation4], 1 }
  0x1f   :  { %128 = vsyncpa [#allocation4 + $0x1], 1 }

// kernel: _fwd.1
= control target key start
LH: loop header
LB: loop body
LE: loop exit
PB: predicated region body
PF: predicated region fallthrough
CT: control target
= control target key end

     0   :  { %10 = vsyncpa [#allocation3], 0  ;;  %s458_s0 = inlined_call_operand.vmem [shape: f32[16,128], index: 0, kind: input, shape index: {}]   ;;  %s459_s1 = inlined_call_operand.vmem [shape: bf16[128,128], index: 1, kind: input, shape index: {}]   ;;  %s460_s2 = inlined_call_operand.vmem [shape: f32[1,128], index: 2, kind: input, shape index: {}]   ;;  %s461_s3 = inlined_call_operand.hbm [shape: bf16[128,128], index: 3, kind: input, shape index: {}]   ;;  %s462_s4 = inlined_call_operand.vmem [shape: f32[1,128], index: 4, kind: input, shape index: {}]   ;;  %s463_s5 = inlined_call_operand.hbm [shape: f32[16,128], index: 5, kind: output, shape index: {}]  }
   0x1   :  { %11 = vsyncpa [#allocation4], 0  ;;  %s22_s20 = sshll.u32 %s461_s3, 4  ;;  %s380_s21 = smov [#allocation2]   ;;  %s23_s20 = int_to_ptr.hbm [resolvable:$true] %s22_s20 }
   0x2   :  { %s24_s22 = sshll.u32 %s380_s21, 4  ;;  %s381_s23 = smov 64   ;;  %s25_s22 = int_to_ptr.vmem [resolvable:$true] %s24_s22 }
   0x3   :  { %s382_s24 = smov 4  }
   0x4   :  { %30 = dma.hbm_to_vmem [thread:$0]  %s23_s20, 1024, %s25_s22, [#allocation3], %s381_s23, %s381_s23, %s382_s24  }
   0x5   :  { %376 = dma.done.wait [#allocation3], 1024  }
   0x6   :  { %377 = vsyncadd [#allocation3], 4294966272  ;;  %v303_v0 = vld [vmem:[%s459_s1 + $0x38] sm:$0xff]  ;;  %v302_v1 = vld [vmem:[%s459_s1 + $0x30] sm:$0xff]  ;;  %s219_s24 = sshll.u32 %s463_s5, 4  ;;  %s385_s25 = smov 8   ;;  %s220_s24 = int_to_ptr.hbm [resolvable:$true] %s219_s24 }
   0x7   :  { %108 = vmatpush.bf16.msra.mxu0 %v303_v0  ;;  %v311_v2 = vld [vmem:[#allocation2 + $0x38] sm:$0xff]  ;;  %v310_v3 = vld [vmem:[#allocation2 + $0x30] sm:$0xff]  ;;  %v301_v4 = vld [vmem:[%s459_s1 + $0x28] sm:$0xff] }
   0x8   :  { %193 = vmatpush.bf16.msra.mxu1 %v311_v2  ;;  %v309_v5 = vld [vmem:[#allocation2 + $0x28] sm:$0xff]  ;;  %v300_v6 = vld [vmem:[%s459_s1 + $0x20] sm:$0xff]  ;;  %v299_v7 = vld [vmem:[%s459_s1 + $0x18] sm:$0xff] }
   0x9   :  { %v298_v8 = vld [vmem:[%s459_s1 + $0x10] sm:$0xff]  ;;  %v297_v9 = vld [vmem:[%s459_s1 + $0x8] sm:$0xff]  ;;  %v296_v10 = vld [vmem:[%s459_s1] sm:$0xff] }
   0xa   :  { %v37_v11 = vld [vmem:[%s458_s0] sm:$0xff]  ;;  %v38_v12 = vld [vmem:[%s458_s0 + $0x8] sm:$0xff]  ;;  %v307_v15 = vld [vmem:[#allocation2 + $0x18] sm:$0xff] }
   0xb   :  { %109 = vmatpush.bf16.msra.mxu0 %v302_v1  ;;  %v39_v13 = vpack.c.bf16 %v38_v12, %v37_v11  ;;  %v308_v14 = vld [vmem:[#allocation2 + $0x20] sm:$0xff]  ;;  %v306_v16 = vld [vmem:[#allocation2 + $0x10] sm:$0xff]  ;;  %v305_v17 = vld [vmem:[#allocation2 + $0x8] sm:$0xff] }
   0xc   :  { %194 = vmatpush.bf16.msra.mxu1 %v310_v3  ;;  %v304_v18 = vld [vmem:[#allocation2] sm:$0xff] }
   0xd   :  { %v318_v20 = vld [vmem:[%s460_s2] ss:$0 sm:$0xff]  ;;  %s383_s2 = smov [#allocation5]  }
   0xe   :  { %v319_v27 = vld [vmem:[%s462_s4] ss:$0 sm:$0xff]  ;;  %s217_s21 = sshll.u32 %s383_s2, 4  ;;  %s384_s4 = smov 128   ;;  %s218_s21 = int_to_ptr.vmem [resolvable:$true] %s217_s21 }
   0xf   :  { %110 = vmatpush.bf16.msra.mxu0 %v301_v4 }
  0x10   :  { %195 = vmatpush.bf16.msra.mxu1 %v309_v5 }
  0x13   :  { %111 = vmatpush.bf16.msra.mxu0 %v300_v6 }
  0x14   :  { %196 = vmatpush.bf16.msra.mxu1 %v308_v14 }
  0x17   :  { %112 = vmatpush.bf16.msra.mxu0 %v299_v7 }
  0x18   :  { %197 = vmatpush.bf16.msra.mxu1 %v307_v15 }
  0x1b   :  { %113 = vmatpush.bf16.msra.mxu0 %v298_v8 }
  0x1c   :  { %198 = vmatpush.bf16.msra.mxu1 %v306_v16 }
  0x1f   :  { %114 = vmatpush.bf16.msra.mxu0 %v297_v9 }
  0x20   :  { %199 = vmatpush.bf16.msra.mxu1 %v305_v17 }
  0x23   :  { %115 = vmatpush.bf16.msra.mxu0 %v296_v10 }
  0x24   :  { %200 = vmatpush.bf16.msra.mxu1 %v304_v18 }
  0x26   :  { %116 = vmatmul.bf16.vlgmr.msra.gmra.mxu0 %v39_v13 }
  0xa3   :  { %v117_v19 = vpop.f32.mrf.mxu0 }
  0xa4   :  { %v118_v21 = vadd.f32 %v318_v20, %v117_v19 }
  0xa6   :  { %320 = vtanh.f32 %v118_v21 }
  0xab   :  { %v119_v22 = vpop.f32.mrf.mxu0 }
  0xac   :  { %v120_v23 = vadd.f32 %v318_v20, %v119_v22  ;;  %v321_v24 = vpop.eup %320 }
  0xae   :  { %322 = vtanh.f32 %v120_v23 }
  0xb4   :  { %v323_v25 = vpop.eup %322 }
  0xb5   :  { %v124_v26 = vpack.c.bf16 %v323_v25, %v321_v24 }
  0xb7   :  { %201 = vmatmul.bf16.vlgmr.msra.gmra.mxu1 %v124_v26 }
 0x134   :  { %v202_v28 = vpop.f32.mrf.mxu1 }
 0x135   :  { %v203_v29 = vadd.f32 %v319_v27, %v202_v28 }
 0x137   :  { %324 = vtanh.f32 %v203_v29 }
 0x13c   :  { %v204_v30 = vpop.f32.mrf.mxu1 }
 0x13d   :  { %v325_v31 = vpop.eup %324  ;;  %v205_v32 = vadd.f32 %v319_v27, %v204_v30 }
 0x13e   :  { %v209_v33 = vadd.f32 %v325_v31, %v37_v11 }
 0x13f   :  { %326 = vtanh.f32 %v205_v32 }
 0x140   :  { %211 = vst [vmem:[#allocation5] sm:$0xff] %v209_v33 }
 0x145   :  { %v327_v34 = vpop.eup %326 }
 0x146   :  { %v210_v35 = vadd.f32 %v327_v34, %v38_v12 }
 0x148   :  { %212 = vst [vmem:[#allocation5 + $0x8] sm:$0xff] %v210_v35 }
 0x149   :  { %225 = dma.vmem_to_hbm [thread:$0]  %s218_s21, 256, %s220_s24, [#allocation4], %s384_s4, %s384_s4, %s385_s25  }
 0x14a   :  { %378 = dma.done.wait [#allocation4], 256  }
 0x14b   :  { %379 = vsyncadd [#allocation4], 4294967040 }
 0x14c   :  { %230 = vsyncpa [#allocation3], 1 }
 0x14d   :  { %231 = vsyncpa [#allocation4], 1 }

</bundles_post_ra>
